<compile_context>
chip_gen: v7x
topology: tpu7x:2x2x1
jax: 0.10.0
libtpu: 0.0.40
codegen_flags: <defaults>
</compile_context>

<pallas_src>
import functools

import jax
import jax.numpy as jnp
import numpy as np
from jax.experimental import pallas as pl
from jax.experimental.pallas import tpu as pltpu


def _round_up(a, m):
    return ((a + m - 1) // m) * m


def _cdiv(a, b):
    return -(-a // b)


def _choose_block_rows(s_rows, c, x_bytes, t_bytes):
    """Rows (of 128 lanes) per grid step.

    Targets ~2 MiB of prediction data per step while keeping the
    double-buffered input footprint under ~12 MiB of VMEM; balances the tile
    count so padding is minimal.
    """
    target = (2 << 20) // (128 * c * x_bytes)
    vmem_cap = (12 << 20) // (2 * 128 * (c * x_bytes + t_bytes))
    st = max(8, min(target, vmem_cap))
    if s_rows <= st:
        return _round_up(s_rows, 8)
    n = _cdiv(s_rows, st)
    return _round_up(_cdiv(s_rows, n), 8)


def _dice_sums_kernel(x_ref, t_ref, out_ref, *, hw, apply_softmax, need_mask,
                      compute_dtype):
    """Per-(batch, spatial-tile) partial dice sums.

    x_ref:   (C, St, 128)  predictions for one image tile, native dtype.
    t_ref:   (St, 128)     integer labels (pad region holds class id C).
    out_ref: (3, C, 128)   f32 per-lane [intersect; y_sum; z_sum]; resident
                           across the tile axis and accumulated in place.
    """
    i = pl.program_id(1)
    n_tiles = pl.num_programs(1)

    @pl.when(i == 0)
    def _init():
        out_ref[...] = jnp.zeros_like(out_ref)

    def accumulate(mask_tail):
        c, st, ln = x_ref.shape
        t = t_ref[...].astype(jnp.int32)
        xs = [x_ref[ci].astype(compute_dtype) for ci in range(c)]

        if apply_softmax:
            m = xs[0]
            for xc in xs[1:]:
                m = jnp.maximum(m, xc)          # class-axis max: pure VALU
            # exp kept in f32 for portability (v5e EUP has no bf16 path); on
            # v6e/v7x this can be switched to native-dtype exp (bf16 EUP).
            es = [jnp.exp((xc - m).astype(jnp.float32)).astype(compute_dtype)
                  for xc in xs]
            denom = es[0]
            for ec in es[1:]:
                denom = denom + ec
            inv = pl.reciprocal(denom.astype(jnp.float32)).astype(compute_dtype)
            ps = [ec * inv for ec in es]        # one EUP recip + C multiplies
        else:
            ps = xs

        if mask_tail:
            # Zero-padded tail exists only in the last tile.  Labels are padded
            # with class id C, so one-hot terms are already clean; only the
            # softmax z_sum (p == 1/C in the pad) needs masking.
            row = jax.lax.broadcasted_iota(jnp.int32, (st, ln), 0)
            lane = jax.lax.broadcasted_iota(jnp.int32, (st, ln), 1)
            valid = (i * st + row) * ln + lane < hw

        inter_rows, y_rows, z_rows = [], [], []
        for ci in range(c):
            p_c = ps[ci]
            oh = t == ci
            oh_f = oh.astype(compute_dtype)
            p_sq = p_c * p_c
            if mask_tail:
                p_sq = jnp.where(valid, p_sq, 0.0)
            # Sublane-axis reduction per tile (f32 accumulation); the 128-lane
            # reduction is deferred to the wrapper so the output stays lane-dense.
            inter_rows.append(jnp.sum((p_c * oh_f).astype(jnp.float32),
                                      axis=0, keepdims=True))
            y_rows.append(jnp.sum(oh.astype(jnp.float32), axis=0, keepdims=True))
            z_rows.append(jnp.sum(p_sq.astype(jnp.float32), axis=0, keepdims=True))

        out_ref[0, :, :] = out_ref[0, :, :] + jnp.concatenate(inter_rows, axis=0)
        out_ref[1, :, :] = out_ref[1, :, :] + jnp.concatenate(y_rows, axis=0)
        out_ref[2, :, :] = out_ref[2, :, :] + jnp.concatenate(z_rows, axis=0)

    if need_mask:
        # Only the last tile pays for the iota/compare/where tail mask.
        @pl.when(i < n_tiles - 1)
        def _main_tiles():
            accumulate(False)

        @pl.when(i == n_tiles - 1)
        def _tail_tile():
            accumulate(True)
    else:
        accumulate(False)


@functools.partial(jax.jit,
                   static_argnames=("softmax", "compute_dtype", "block_rows"))
def dice_loss(inputs, target, weight=None, softmax=False, compute_dtype=None,
              block_rows=None):
    """JAX/Pallas equivalent of DiceLoss(n_classes).forward(inputs, target)."""
    smooth = 1e-5
    b, c, h, w = inputs.shape
    hw = h * w
    cdt = jnp.dtype(jnp.float32 if compute_dtype is None else compute_dtype)

    # Free reshape views; predictions keep their native dtype in HBM.
    x = inputs.reshape(b, c, hw)
    t = target.reshape(b, hw)
    if not jnp.issubdtype(t.dtype, jnp.integer) or t.dtype == jnp.int64:
        t = t.astype(jnp.int32)   # shrink int64/float labels; <=int32 stays narrow

    x_bytes = jnp.dtype(x.dtype).itemsize
    t_bytes = jnp.dtype(t.dtype).itemsize
    s_rows = _cdiv(hw, 128)
    if block_rows is None:
        st = _choose_block_rows(s_rows, c, x_bytes, t_bytes)
    else:
        st = block_rows
    st = max(8, _round_up(st, 8))
    n_tiles = _cdiv(s_rows, st)
    s_pad = n_tiles * st
    hw_pad = s_pad * 128

    if hw_pad != hw:
        # One-time pad so the (rows, 128) reshape is a free view.  Labels get
        # the out-of-range class id C so the pad never matches a real class;
        # predictions get 0 so the non-softmax sums are untouched.
        x = jnp.pad(x, ((0, 0), (0, 0), (0, hw_pad - hw)))
        t = jnp.pad(t, ((0, 0), (0, hw_pad - hw)), constant_values=c)
    x = x.reshape(b, c, s_pad, 128)
    t = t.reshape(b, s_pad, 128)

    # With the padding scheme above, only the softmax z_sum sees the pad.
    need_mask = softmax and (hw_pad != hw)

    kernel = functools.partial(
        _dice_sums_kernel, hw=hw, apply_softmax=softmax, need_mask=need_mask,
        compute_dtype=cdt)

    partials = pl.pallas_call(
        kernel,
        out_shape=jax.ShapeDtypeStruct((b, 3, c, 128), jnp.float32),
        grid=(b, n_tiles),
        in_specs=[
            pl.BlockSpec((None, c, st, 128), lambda bb, i: (bb, 0, i, 0)),
            pl.BlockSpec((None, st, 128), lambda bb, i: (bb, i, 0)),
        ],
        out_specs=pl.BlockSpec((None, 3, c, 128), lambda bb, i: (bb, 0, 0, 0)),
        compiler_params=pltpu.CompilerParams(
            # Batch -> TensorCore-parallel; spatial tiles -> reduction.
            dimension_semantics=("parallel", "arbitrary"),
            vmem_limit_bytes=32 * 1024 * 1024,
        ),
    )(x, t)
    # TODO(synk): on v7x with B < 2, add a second "parallel" grid axis that
    # splits the spatial reduction across both TensorCores.

    sums = jnp.sum(partials, axis=(0, 3))                 # (3, C) totals
    intersect, y_sum, z_sum = sums[0], sums[1], sums[2]
    dice = 1.0 - (2.0 * intersect + smooth) / (z_sum + y_sum + smooth)

    if weight is None:
        weight = jnp.ones((c,), jnp.float32)
    else:
        weight = jnp.asarray(weight, jnp.float32)
    return jnp.sum(dice * weight) / c


def _dice_loss_reference(inputs, target, weight=None, softmax=False):
    """Pure-JAX reference mirroring the PyTorch module exactly."""
    smooth = 1e-5
    b, c, h, w = inputs.shape
    if softmax:
        inputs = jax.nn.softmax(inputs, axis=1)
    onehot = (target[:, None, :, :]
              == jnp.arange(c)[None, :, None, None]).astype(jnp.float32)
    if weight is None:
        weight = [1.0] * c
    loss = 0.0
    for i in range(c):
        score = inputs[:, i]
        tgt = onehot[:, i]
        intersect = jnp.sum(score * tgt)
        y_sum = jnp.sum(tgt * tgt)
        z_sum = jnp.sum(score * score)
        dice = 1.0 - (2.0 * intersect + smooth) / (z_sum + y_sum + smooth)
        loss = loss + dice * weight[i]
    return loss / c


if __name__ == "__main__":
    key = jax.random.PRNGKey(0)
    k1, k2, k3, k4, k5, k6 = jax.random.split(key, 6)

    # Case 1: f32 logits, fused softmax, 16x16 spatial (padded to one 8x128 tile,
    # exercises the softmax tail mask).
    B, C, H, W = 2, 4, 16, 16
    logits = jax.random.normal(k1, (B, C, H, W), dtype=jnp.float32)
    target = jax.random.randint(k2, (B, H, W), 0, C, dtype=jnp.int32)
    loss = jax.block_until_ready(dice_loss(logits, target, softmax=True))
    ref = _dice_loss_reference(logits, target, softmax=True)
    np.testing.assert_allclose(np.asarray(loss), np.asarray(ref),
                               rtol=1e-5, atol=1e-6)

    # Case 2: bf16 logits kept bf16 in HBM, ragged 10x10 spatial, class weights.
    B2, C2, H2, W2 = 2, 4, 10, 10
    logits2 = jax.random.normal(k3, (B2, C2, H2, W2), dtype=jnp.bfloat16)
    target2 = jax.random.randint(k4, (B2, H2, W2), 0, C2, dtype=jnp.int32)
    w2 = [0.5, 1.0, 1.5, 2.0]
    loss2 = jax.block_until_ready(
        dice_loss(logits2, target2, weight=w2, softmax=True))
    ref2 = _dice_loss_reference(logits2.astype(jnp.float32), target2,
                                weight=w2, softmax=True)
    np.testing.assert_allclose(np.asarray(loss2), np.asarray(ref2),
                               rtol=1e-4, atol=1e-5)

    # Case 3: probability inputs, softmax=False path (no tail mask needed).
    probs = jax.nn.softmax(logits, axis=1)
    loss3 = jax.block_until_ready(dice_loss(probs, target, softmax=False))
    ref3 = _dice_loss_reference(probs, target, softmax=False)
    np.testing.assert_allclose(np.asarray(loss3), np.asarray(ref3),
                               rtol=1e-5, atol=1e-6)

    # Case 4: multi-tile reduction path (forced small block_rows), odd class count.
    B4, C4, H4, W4 = 2, 3, 48, 48
    logits4 = jax.random.normal(k5, (B4, C4, H4, W4), dtype=jnp.float32)
    target4 = jax.random.randint(k6, (B4, H4, W4), 0, C4, dtype=jnp.int32)
    loss4 = jax.block_until_ready(
        dice_loss(logits4, target4, softmax=True, block_rows=8))
    ref4 = _dice_loss_reference(logits4, target4, softmax=True)
    np.testing.assert_allclose(np.asarray(loss4), np.asarray(ref4),
                               rtol=1e-5, atol=1e-6)

    # Case 5: bf16 elementwise compute (v6e/v7x fast path); accumulation in f32.
    loss5 = jax.block_until_ready(
        dice_loss(logits2, target2, weight=w2, softmax=True,
                  compute_dtype=jnp.bfloat16))
    np.testing.assert_allclose(np.asarray(loss5), np.asarray(ref2),
                               rtol=5e-2, atol=3e-2)

    print("KERNEL_OK")
</pallas_src>

<mosaic_0001>
module attributes {stable_mosaic.version = 11 : i64} {
  func.func @_dice_sums_kernel(%arg0: i32, %arg1: i32, %arg2: memref<1x4x8x128xf32, #tpu.memory_space<vmem>>, %arg3: memref<1x8x128xi32, #tpu.memory_space<vmem>>, %arg4: memref<1x3x4x128xf32, #tpu.memory_space<vmem>>) attributes {dimension_semantics = [#tpu.dimension_semantics<parallel>, #tpu.dimension_semantics<arbitrary>], iteration_bounds = array<i64: 2, 1>, scalar_prefetch = 0 : i64, scratch_operands = 0 : i64, tpu.core_type = #tpu.core_type<tc>, window_params = [{transform_indices = @transform_0, window_bounds = array<i64: 1, 4, 8, 128>}, {transform_indices = @transform_1, window_bounds = array<i64: 1, 8, 128>}, {transform_indices = @transform_2, window_bounds = array<i64: 1, 3, 4, 128>}]} {
    %c0_i32 = arith.constant 0 : i32
    %0 = arith.cmpi eq, %arg1, %c0_i32 : i32
    %1 = arith.extui %0 : i1 to i32
    %c0_i32_0 = arith.constant 0 : i32
    %2 = arith.cmpi ne, %1, %c0_i32_0 : i32
    scf.if %2 {
      %cst = arith.constant 0.000000e+00 : f32
      %9 = vector.broadcast %cst : f32 to vector<3x4x128xf32>
      %c0 = arith.constant 0 : index
      %c0_5 = arith.constant 0 : index
      %c0_6 = arith.constant 0 : index
      %c0_7 = arith.constant 0 : index
      %10 = vector.load %arg4[%c0, %c0_5, %c0_6, %c0_7] : memref<1x3x4x128xf32, #tpu.memory_space<vmem>>, vector<1x3x4x128xf32>
      %11 = vector.shape_cast %10 : vector<1x3x4x128xf32> to vector<3x4x128xf32>
      %12 = vector.shape_cast %9 : vector<3x4x128xf32> to vector<1x3x4x128xf32>
      tpu.vector_store %arg4[%c0, %c0_5, %c0_6, %c0_7], %12 {strides = array<i32>} : memref<1x3x4x128xf32, #tpu.memory_space<vmem>>, vector<1x3x4x128xf32>,
    } else {
    }
    %c0_i32_1 = arith.constant 0 : i32
    %3 = arith.cmpi slt, %arg1, %c0_i32_1 : i32
    %4 = arith.extui %3 : i1 to i32
    %c0_i32_2 = arith.constant 0 : i32
    %5 = arith.cmpi ne, %4, %c0_i32_2 : i32
    scf.if %5 {
      %c0 = arith.constant 0 : index
      %c0_5 = arith.constant 0 : index
      %c0_6 = arith.constant 0 : index
      %9 = vector.load %arg3[%c0, %c0_5, %c0_6] : memref<1x8x128xi32, #tpu.memory_space<vmem>>, vector<1x8x128xi32>
      %10 = vector.shape_cast %9 : vector<1x8x128xi32> to vector<8x128xi32>
      %c0_7 = arith.constant 0 : index
      %c0_8 = arith.constant 0 : index
      %c0_9 = arith.constant 0 : index
      %c0_10 = arith.constant 0 : index
      %11 = vector.load %arg2[%c0_7, %c0_8, %c0_9, %c0_10] : memref<1x4x8x128xf32, #tpu.memory_space<vmem>>, vector<1x1x8x128xf32>
      %12 = vector.shape_cast %11 : vector<1x1x8x128xf32> to vector<8x128xf32>
      %c0_11 = arith.constant 0 : index
      %c1 = arith.constant 1 : index
      %c0_12 = arith.constant 0 : index
      %c0_13 = arith.constant 0 : index
      %13 = vector.load %arg2[%c0_11, %c1, %c0_12, %c0_13] : memref<1x4x8x128xf32, #tpu.memory_space<vmem>>, vector<1x1x8x128xf32>
      %14 = vector.shape_cast %13 : vector<1x1x8x128xf32> to vector<8x128xf32>
      %c0_14 = arith.constant 0 : index
      %c2 = arith.constant 2 : index
      %c0_15 = arith.constant 0 : index
      %c0_16 = arith.constant 0 : index
      %15 = vector.load %arg2[%c0_14, %c2, %c0_15, %c0_16] : memref<1x4x8x128xf32, #tpu.memory_space<vmem>>, vector<1x1x8x128xf32>
      %16 = vector.shape_cast %15 : vector<1x1x8x128xf32> to vector<8x128xf32>
      %c0_17 = arith.constant 0 : index
      %c3 = arith.constant 3 : index
      %c0_18 = arith.constant 0 : index
      %c0_19 = arith.constant 0 : index
      %17 = vector.load %arg2[%c0_17, %c3, %c0_18, %c0_19] : memref<1x4x8x128xf32, #tpu.memory_space<vmem>>, vector<1x1x8x128xf32>
      %18 = vector.shape_cast %17 : vector<1x1x8x128xf32> to vector<8x128xf32>
      %19 = arith.maximumf %12, %14 : vector<8x128xf32>
      %20 = arith.maximumf %19, %16 : vector<8x128xf32>
      %21 = arith.maximumf %20, %18 : vector<8x128xf32>
      %22 = arith.subf %12, %21 : vector<8x128xf32>
      %23 = math.exp %22 : vector<8x128xf32>
      %24 = arith.subf %14, %21 : vector<8x128xf32>
      %25 = math.exp %24 : vector<8x128xf32>
      %26 = arith.subf %16, %21 : vector<8x128xf32>
      %27 = math.exp %26 : vector<8x128xf32>
      %28 = arith.subf %18, %21 : vector<8x128xf32>
      %29 = math.exp %28 : vector<8x128xf32>
      %30 = arith.addf %23, %25 : vector<8x128xf32>
      %31 = arith.addf %30, %27 : vector<8x128xf32>
      %32 = arith.addf %31, %29 : vector<8x128xf32>
      %33 = tpu.reciprocal %32 : vector<8x128xf32> -> vector<8x128xf32>
      %34 = arith.mulf %23, %33 : vector<8x128xf32>
      %35 = arith.mulf %25, %33 : vector<8x128xf32>
      %36 = arith.mulf %27, %33 : vector<8x128xf32>
      %37 = arith.mulf %29, %33 : vector<8x128xf32>
      %c0_i32_20 = arith.constant 0 : i32
      %38 = vector.broadcast %c0_i32_20 : i32 to vector<8x128xi32>
      %39 = arith.cmpi eq, %10, %38 : vector<8x128xi32>
      %40 = arith.extui %39 : vector<8x128xi1> to vector<8x128xi32>
      %41 = arith.sitofp %40 : vector<8x128xi32> to vector<8x128xf32>
      %42 = arith.mulf %34, %34 : vector<8x128xf32>
      %43 = arith.mulf %34, %41 : vector<8x128xf32>
      %cst = arith.constant dense<0.000000e+00> : vector<128xf32>
      %44 = vector.multi_reduction <add>, %43, %cst [0] : vector<8x128xf32> to vector<128xf32>
      %45 = vector.shape_cast %44 : vector<128xf32> to vector<1x128xf32>
      %46 = arith.extui %39 : vector<8x128xi1> to vector<8x128xi32>
      %47 = arith.sitofp %46 : vector<8x128xi32> to vector<8x128xf32>
      %cst_21 = arith.constant dense<0.000000e+00> : vector<128xf32>
      %48 = vector.multi_reduction <add>, %47, %cst_21 [0] : vector<8x128xf32> to vector<128xf32>
      %49 = vector.shape_cast %48 : vector<128xf32> to vector<1x128xf32>
      %cst_22 = arith.constant dense<0.000000e+00> : vector<128xf32>
      %50 = vector.multi_reduction <add>, %42, %cst_22 [0] : vector<8x128xf32> to vector<128xf32>
      %51 = vector.shape_cast %50 : vector<128xf32> to vector<1x128xf32>
      %c1_i32 = arith.constant 1 : i32
      %52 = vector.broadcast %c1_i32 : i32 to vector<8x128xi32>
      %53 = arith.cmpi eq, %10, %52 : vector<8x128xi32>
      %54 = arith.extui %53 : vector<8x128xi1> to vector<8x128xi32>
      %55 = arith.sitofp %54 : vector<8x128xi32> to vector<8x128xf32>
      %56 = arith.mulf %35, %35 : vector<8x128xf32>
      %57 = arith.mulf %35, %55 : vector<8x128xf32>
      %cst_23 = arith.constant dense<0.000000e+00> : vector<128xf32>
      %58 = vector.multi_reduction <add>, %57, %cst_23 [0] : vector<8x128xf32> to vector<128xf32>
      %59 = vector.shape_cast %58 : vector<128xf32> to vector<1x128xf32>
      %60 = arith.extui %53 : vector<8x128xi1> to vector<8x128xi32>
      %61 = arith.sitofp %60 : vector<8x128xi32> to vector<8x128xf32>
      %cst_24 = arith.constant dense<0.000000e+00> : vector<128xf32>
      %62 = vector.multi_reduction <add>, %61, %cst_24 [0] : vector<8x128xf32> to vector<128xf32>
      %63 = vector.shape_cast %62 : vector<128xf32> to vector<1x128xf32>
      %cst_25 = arith.constant dense<0.000000e+00> : vector<128xf32>
      %64 = vector.multi_reduction <add>, %56, %cst_25 [0] : vector<8x128xf32> to vector<128xf32>
      %65 = vector.shape_cast %64 : vector<128xf32> to vector<1x128xf32>
      %c2_i32 = arith.constant 2 : i32
      %66 = vector.broadcast %c2_i32 : i32 to vector<8x128xi32>
      %67 = arith.cmpi eq, %10, %66 : vector<8x128xi32>
      %68 = arith.extui %67 : vector<8x128xi1> to vector<8x128xi32>
      %69 = arith.sitofp %68 : vector<8x128xi32> to vector<8x128xf32>
      %70 = arith.mulf %36, %36 : vector<8x128xf32>
      %71 = arith.mulf %36, %69 : vector<8x128xf32>
      %cst_26 = arith.constant dense<0.000000e+00> : vector<128xf32>
      %72 = vector.multi_reduction <add>, %71, %cst_26 [0] : vector<8x128xf32> to vector<128xf32>
      %73 = vector.shape_cast %72 : vector<128xf32> to vector<1x128xf32>
      %74 = arith.extui %67 : vector<8x128xi1> to vector<8x128xi32>
      %75 = arith.sitofp %74 : vector<8x128xi32> to vector<8x128xf32>
      %cst_27 = arith.constant dense<0.000000e+00> : vector<128xf32>
      %76 = vector.multi_reduction <add>, %75, %cst_27 [0] : vector<8x128xf32> to vector<128xf32>
      %77 = vector.shape_cast %76 : vector<128xf32> to vector<1x128xf32>
      %cst_28 = arith.constant dense<0.000000e+00> : vector<128xf32>
      %78 = vector.multi_reduction <add>, %70, %cst_28 [0] : vector<8x128xf32> to vector<128xf32>
      %79 = vector.shape_cast %78 : vector<128xf32> to vector<1x128xf32>
      %c3_i32 = arith.constant 3 : i32
      %80 = vector.broadcast %c3_i32 : i32 to vector<8x128xi32>
      %81 = arith.cmpi eq, %10, %80 : vector<8x128xi32>
      %82 = arith.extui %81 : vector<8x128xi1> to vector<8x128xi32>
      %83 = arith.sitofp %82 : vector<8x128xi32> to vector<8x128xf32>
      %84 = arith.mulf %37, %37 : vector<8x128xf32>
      %85 = arith.mulf %37, %83 : vector<8x128xf32>
      %cst_29 = arith.constant dense<0.000000e+00> : vector<128xf32>
      %86 = vector.multi_reduction <add>, %85, %cst_29 [0] : vector<8x128xf32> to vector<128xf32>
      %87 = vector.shape_cast %86 : vector<128xf32> to vector<1x128xf32>
      %88 = arith.extui %81 : vector<8x128xi1> to vector<8x128xi32>
      %89 = arith.sitofp %88 : vector<8x128xi32> to vector<8x128xf32>
      %cst_30 = arith.constant dense<0.000000e+00> : vector<128xf32>
      %90 = vector.multi_reduction <add>, %89, %cst_30 [0] : vector<8x128xf32> to vector<128xf32>
      %91 = vector.shape_cast %90 : vector<128xf32> to vector<1x128xf32>
      %cst_31 = arith.constant dense<0.000000e+00> : vector<128xf32>
      %92 = vector.multi_reduction <add>, %84, %cst_31 [0] : vector<8x128xf32> to vector<128xf32>
      %93 = vector.shape_cast %92 : vector<128xf32> to vector<1x128xf32>
      %c0_32 = arith.constant 0 : index
      %c0_33 = arith.constant 0 : index
      %c0_34 = arith.constant 0 : index
      %c0_35 = arith.constant 0 : index
      %94 = vector.load %arg4[%c0_32, %c0_33, %c0_34, %c0_35] : memref<1x3x4x128xf32, #tpu.memory_space<vmem>>, vector<1x1x4x128xf32>
      %95 = vector.shape_cast %94 : vector<1x1x4x128xf32> to vector<4x128xf32>
      %96 = tpu.concatenate %45, %59, %73, %87 in 0 : vector<1x128xf32>, vector<1x128xf32>, vector<1x128xf32>, vector<1x128xf32> -> vector<4x128xf32>
      %97 = arith.addf %95, %96 : vector<4x128xf32>
      %c0_36 = arith.constant 0 : index
      %c0_37 = arith.constant 0 : index
      %c0_38 = arith.constant 0 : index
      %c0_39 = arith.constant 0 : index
      %98 = vector.load %arg4[%c0_36, %c0_37, %c0_38, %c0_39] : memref<1x3x4x128xf32, #tpu.memory_space<vmem>>, vector<1x1x4x128xf32>
      %99 = vector.shape_cast %98 : vector<1x1x4x128xf32> to vector<4x128xf32>
      %100 = vector.shape_cast %97 : vector<4x128xf32> to vector<1x1x4x128xf32>
      tpu.vector_store %arg4[%c0_36, %c0_37, %c0_38, %c0_39], %100 {strides = array<i32>} : memref<1x3x4x128xf32, #tpu.memory_space<vmem>>, vector<1x1x4x128xf32>,
      %c0_40 = arith.constant 0 : index
      %c1_41 = arith.constant 1 : index
      %c0_42 = arith.constant 0 : index
      %c0_43 = arith.constant 0 : index
      %101 = vector.load %arg4[%c0_40, %c1_41, %c0_42, %c0_43] : memref<1x3x4x128xf32, #tpu.memory_space<vmem>>, vector<1x1x4x128xf32>
      %102 = vector.shape_cast %101 : vector<1x1x4x128xf32> to vector<4x128xf32>
      %103 = tpu.concatenate %49, %63, %77, %91 in 0 : vector<1x128xf32>, vector<1x128xf32>, vector<1x128xf32>, vector<1x128xf32> -> vector<4x128xf32>
      %104 = arith.addf %102, %103 : vector<4x128xf32>
      %c0_44 = arith.constant 0 : index
      %c1_45 = arith.constant 1 : index
      %c0_46 = arith.constant 0 : index
      %c0_47 = arith.constant 0 : index
      %105 = vector.load %arg4[%c0_44, %c1_45, %c0_46, %c0_47] : memref<1x3x4x128xf32, #tpu.memory_space<vmem>>, vector<1x1x4x128xf32>
      %106 = vector.shape_cast %105 : vector<1x1x4x128xf32> to vector<4x128xf32>
      %107 = vector.shape_cast %104 : vector<4x128xf32> to vector<1x1x4x128xf32>
      tpu.vector_store %arg4[%c0_44, %c1_45, %c0_46, %c0_47], %107 {strides = array<i32>} : memref<1x3x4x128xf32, #tpu.memory_space<vmem>>, vector<1x1x4x128xf32>,
      %c0_48 = arith.constant 0 : index
      %c2_49 = arith.constant 2 : index
      %c0_50 = arith.constant 0 : index
      %c0_51 = arith.constant 0 : index
      %108 = vector.load %arg4[%c0_48, %c2_49, %c0_50, %c0_51] : memref<1x3x4x128xf32, #tpu.memory_space<vmem>>, vector<1x1x4x128xf32>
      %109 = vector.shape_cast %108 : vector<1x1x4x128xf32> to vector<4x128xf32>
      %110 = tpu.concatenate %51, %65, %79, %93 in 0 : vector<1x128xf32>, vector<1x128xf32>, vector<1x128xf32>, vector<1x128xf32> -> vector<4x128xf32>
      %111 = arith.addf %109, %110 : vector<4x128xf32>
      %c0_52 = arith.constant 0 : index
      %c2_53 = arith.constant 2 : index
      %c0_54 = arith.constant 0 : index
      %c0_55 = arith.constant 0 : index
      %112 = vector.load %arg4[%c0_52, %c2_53, %c0_54, %c0_55] : memref<1x3x4x128xf32, #tpu.memory_space<vmem>>, vector<1x1x4x128xf32>
      %113 = vector.shape_cast %112 : vector<1x1x4x128xf32> to vector<4x128xf32>
      %114 = vector.shape_cast %111 : vector<4x128xf32> to vector<1x1x4x128xf32>
      tpu.vector_store %arg4[%c0_52, %c2_53, %c0_54, %c0_55], %114 {strides = array<i32>} : memref<1x3x4x128xf32, #tpu.memory_space<vmem>>, vector<1x1x4x128xf32>,
    } else {
    }
    %c0_i32_3 = arith.constant 0 : i32
    %6 = arith.cmpi eq, %arg1, %c0_i32_3 : i32
    %7 = arith.extui %6 : i1 to i32
    %c0_i32_4 = arith.constant 0 : i32
    %8 = arith.cmpi ne, %7, %c0_i32_4 : i32
    scf.if %8 {
      %c0 = arith.constant 0 : index
      %c0_5 = arith.constant 0 : index
      %c0_6 = arith.constant 0 : index
      %9 = vector.load %arg3[%c0, %c0_5, %c0_6] : memref<1x8x128xi32, #tpu.memory_space<vmem>>, vector<1x8x128xi32>
      %10 = vector.shape_cast %9 : vector<1x8x128xi32> to vector<8x128xi32>
      %c0_7 = arith.constant 0 : index
      %c0_8 = arith.constant 0 : index
      %c0_9 = arith.constant 0 : index
      %c0_10 = arith.constant 0 : index
      %11 = vector.load %arg2[%c0_7, %c0_8, %c0_9, %c0_10] : memref<1x4x8x128xf32, #tpu.memory_space<vmem>>, vector<1x1x8x128xf32>
      %12 = vector.shape_cast %11 : vector<1x1x8x128xf32> to vector<8x128xf32>
      %c0_11 = arith.constant 0 : index
      %c1 = arith.constant 1 : index
      %c0_12 = arith.constant 0 : index
      %c0_13 = arith.constant 0 : index
      %13 = vector.load %arg2[%c0_11, %c1, %c0_12, %c0_13] : memref<1x4x8x128xf32, #tpu.memory_space<vmem>>, vector<1x1x8x128xf32>
      %14 = vector.shape_cast %13 : vector<1x1x8x128xf32> to vector<8x128xf32>
      %c0_14 = arith.constant 0 : index
      %c2 = arith.constant 2 : index
      %c0_15 = arith.constant 0 : index
      %c0_16 = arith.constant 0 : index
      %15 = vector.load %arg2[%c0_14, %c2, %c0_15, %c0_16] : memref<1x4x8x128xf32, #tpu.memory_space<vmem>>, vector<1x1x8x128xf32>
      %16 = vector.shape_cast %15 : vector<1x1x8x128xf32> to vector<8x128xf32>
      %c0_17 = arith.constant 0 : index
      %c3 = arith.constant 3 : index
      %c0_18 = arith.constant 0 : index
      %c0_19 = arith.constant 0 : index
      %17 = vector.load %arg2[%c0_17, %c3, %c0_18, %c0_19] : memref<1x4x8x128xf32, #tpu.memory_space<vmem>>, vector<1x1x8x128xf32>
      %18 = vector.shape_cast %17 : vector<1x1x8x128xf32> to vector<8x128xf32>
      %19 = arith.maximumf %12, %14 : vector<8x128xf32>
      %20 = arith.maximumf %19, %16 : vector<8x128xf32>
      %21 = arith.maximumf %20, %18 : vector<8x128xf32>
      %22 = arith.subf %12, %21 : vector<8x128xf32>
      %23 = math.exp %22 : vector<8x128xf32>
      %24 = arith.subf %14, %21 : vector<8x128xf32>
      %25 = math.exp %24 : vector<8x128xf32>
      %26 = arith.subf %16, %21 : vector<8x128xf32>
      %27 = math.exp %26 : vector<8x128xf32>
      %28 = arith.subf %18, %21 : vector<8x128xf32>
      %29 = math.exp %28 : vector<8x128xf32>
      %30 = arith.addf %23, %25 : vector<8x128xf32>
      %31 = arith.addf %30, %27 : vector<8x128xf32>
      %32 = arith.addf %31, %29 : vector<8x128xf32>
      %33 = tpu.reciprocal %32 : vector<8x128xf32> -> vector<8x128xf32>
      %34 = arith.mulf %23, %33 : vector<8x128xf32>
      %35 = arith.mulf %25, %33 : vector<8x128xf32>
      %36 = arith.mulf %27, %33 : vector<8x128xf32>
      %37 = arith.mulf %29, %33 : vector<8x128xf32>
      %38 = tpu.iota {dimensions = array<i32: 0>} : vector<8x128xi32>
      %39 = tpu.iota {dimensions = array<i32: 1>} : vector<8x128xi32>
      %c8_i32 = arith.constant 8 : i32
      %40 = arith.muli %arg1, %c8_i32 : i32
      %41 = vector.broadcast %40 : i32 to vector<8x128xi32>
      %42 = arith.addi %41, %38 : vector<8x128xi32>
      %c128_i32 = arith.constant 128 : i32
      %43 = vector.broadcast %c128_i32 : i32 to vector<8x128xi32>
      %44 = arith.muli %42, %43 : vector<8x128xi32>
      %45 = arith.addi %44, %39 : vector<8x128xi32>
      %c256_i32 = arith.constant 256 : i32
      %46 = vector.broadcast %c256_i32 : i32 to vector<8x128xi32>
      %47 = arith.cmpi slt, %45, %46 : vector<8x128xi32>
      %c0_i32_20 = arith.constant 0 : i32
      %48 = vector.broadcast %c0_i32_20 : i32 to vector<8x128xi32>
      %49 = arith.cmpi eq, %10, %48 : vector<8x128xi32>
      %50 = arith.extui %49 : vector<8x128xi1> to vector<8x128xi32>
      %51 = arith.sitofp %50 : vector<8x128xi32> to vector<8x128xf32>
      %52 = arith.mulf %34, %34 : vector<8x128xf32>
      %cst = arith.constant 0.000000e+00 : f32
      %53 = vector.broadcast %cst : f32 to vector<8x128xf32>
      %54 = arith.select %47, %52, %53 : vector<8x128xi1>, vector<8x128xf32>
      %55 = arith.mulf %34, %51 : vector<8x128xf32>
      %cst_21 = arith.constant dense<0.000000e+00> : vector<128xf32>
      %56 = vector.multi_reduction <add>, %55, %cst_21 [0] : vector<8x128xf32> to vector<128xf32>
      %57 = vector.shape_cast %56 : vector<128xf32> to vector<1x128xf32>
      %58 = arith.extui %49 : vector<8x128xi1> to vector<8x128xi32>
      %59 = arith.sitofp %58 : vector<8x128xi32> to vector<8x128xf32>
      %cst_22 = arith.constant dense<0.000000e+00> : vector<128xf32>
      %60 = vector.multi_reduction <add>, %59, %cst_22 [0] : vector<8x128xf32> to vector<128xf32>
      %61 = vector.shape_cast %60 : vector<128xf32> to vector<1x128xf32>
      %cst_23 = arith.constant dense<0.000000e+00> : vector<128xf32>
      %62 = vector.multi_reduction <add>, %54, %cst_23 [0] : vector<8x128xf32> to vector<128xf32>
      %63 = vector.shape_cast %62 : vector<128xf32> to vector<1x128xf32>
      %c1_i32 = arith.constant 1 : i32
      %64 = vector.broadcast %c1_i32 : i32 to vector<8x128xi32>
      %65 = arith.cmpi eq, %10, %64 : vector<8x128xi32>
      %66 = arith.extui %65 : vector<8x128xi1> to vector<8x128xi32>
      %67 = arith.sitofp %66 : vector<8x128xi32> to vector<8x128xf32>
      %68 = arith.mulf %35, %35 : vector<8x128xf32>
      %cst_24 = arith.constant 0.000000e+00 : f32
      %69 = vector.broadcast %cst_24 : f32 to vector<8x128xf32>
      %70 = arith.select %47, %68, %69 : vector<8x128xi1>, vector<8x128xf32>
      %71 = arith.mulf %35, %67 : vector<8x128xf32>
      %cst_25 = arith.constant dense<0.000000e+00> : vector<128xf32>
      %72 = vector.multi_reduction <add>, %71, %cst_25 [0] : vector<8x128xf32> to vector<128xf32>
      %73 = vector.shape_cast %72 : vector<128xf32> to vector<1x128xf32>
      %74 = arith.extui %65 : vector<8x128xi1> to vector<8x128xi32>
      %75 = arith.sitofp %74 : vector<8x128xi32> to vector<8x128xf32>
      %cst_26 = arith.constant dense<0.000000e+00> : vector<128xf32>
      %76 = vector.multi_reduction <add>, %75, %cst_26 [0] : vector<8x128xf32> to vector<128xf32>
      %77 = vector.shape_cast %76 : vector<128xf32> to vector<1x128xf32>
      %cst_27 = arith.constant dense<0.000000e+00> : vector<128xf32>
      %78 = vector.multi_reduction <add>, %70, %cst_27 [0] : vector<8x128xf32> to vector<128xf32>
      %79 = vector.shape_cast %78 : vector<128xf32> to vector<1x128xf32>
      %c2_i32 = arith.constant 2 : i32
      %80 = vector.broadcast %c2_i32 : i32 to vector<8x128xi32>
      %81 = arith.cmpi eq, %10, %80 : vector<8x128xi32>
      %82 = arith.extui %81 : vector<8x128xi1> to vector<8x128xi32>
      %83 = arith.sitofp %82 : vector<8x128xi32> to vector<8x128xf32>
      %84 = arith.mulf %36, %36 : vector<8x128xf32>
      %cst_28 = arith.constant 0.000000e+00 : f32
      %85 = vector.broadcast %cst_28 : f32 to vector<8x128xf32>
      %86 = arith.select %47, %84, %85 : vector<8x128xi1>, vector<8x128xf32>
      %87 = arith.mulf %36, %83 : vector<8x128xf32>
      %cst_29 = arith.constant dense<0.000000e+00> : vector<128xf32>
      %88 = vector.multi_reduction <add>, %87, %cst_29 [0] : vector<8x128xf32> to vector<128xf32>
      %89 = vector.shape_cast %88 : vector<128xf32> to vector<1x128xf32>
      %90 = arith.extui %81 : vector<8x128xi1> to vector<8x128xi32>
      %91 = arith.sitofp %90 : vector<8x128xi32> to vector<8x128xf32>
      %cst_30 = arith.constant dense<0.000000e+00> : vector<128xf32>
      %92 = vector.multi_reduction <add>, %91, %cst_30 [0] : vector<8x128xf32> to vector<128xf32>
      %93 = vector.shape_cast %92 : vector<128xf32> to vector<1x128xf32>
      %cst_31 = arith.constant dense<0.000000e+00> : vector<128xf32>
      %94 = vector.multi_reduction <add>, %86, %cst_31 [0] : vector<8x128xf32> to vector<128xf32>
      %95 = vector.shape_cast %94 : vector<128xf32> to vector<1x128xf32>
      %c3_i32 = arith.constant 3 : i32
      %96 = vector.broadcast %c3_i32 : i32 to vector<8x128xi32>
      %97 = arith.cmpi eq, %10, %96 : vector<8x128xi32>
      %98 = arith.extui %97 : vector<8x128xi1> to vector<8x128xi32>
      %99 = arith.sitofp %98 : vector<8x128xi32> to vector<8x128xf32>
      %100 = arith.mulf %37, %37 : vector<8x128xf32>
      %cst_32 = arith.constant 0.000000e+00 : f32
      %101 = vector.broadcast %cst_32 : f32 to vector<8x128xf32>
      %102 = arith.select %47, %100, %101 : vector<8x128xi1>, vector<8x128xf32>
      %103 = arith.mulf %37, %99 : vector<8x128xf32>
      %cst_33 = arith.constant dense<0.000000e+00> : vector<128xf32>
      %104 = vector.multi_reduction <add>, %103, %cst_33 [0] : vector<8x128xf32> to vector<128xf32>
      %105 = vector.shape_cast %104 : vector<128xf32> to vector<1x128xf32>
      %106 = arith.extui %97 : vector<8x128xi1> to vector<8x128xi32>
      %107 = arith.sitofp %106 : vector<8x128xi32> to vector<8x128xf32>
      %cst_34 = arith.constant dense<0.000000e+00> : vector<128xf32>
      %108 = vector.multi_reduction <add>, %107, %cst_34 [0] : vector<8x128xf32> to vector<128xf32>
      %109 = vector.shape_cast %108 : vector<128xf32> to vector<1x128xf32>
      %cst_35 = arith.constant dense<0.000000e+00> : vector<128xf32>
      %110 = vector.multi_reduction <add>, %102, %cst_35 [0] : vector<8x128xf32> to vector<128xf32>
      %111 = vector.shape_cast %110 : vector<128xf32> to vector<1x128xf32>
      %c0_36 = arith.constant 0 : index
      %c0_37 = arith.constant 0 : index
      %c0_38 = arith.constant 0 : index
      %c0_39 = arith.constant 0 : index
      %112 = vector.load %arg4[%c0_36, %c0_37, %c0_38, %c0_39] : memref<1x3x4x128xf32, #tpu.memory_space<vmem>>, vector<1x1x4x128xf32>
      %113 = vector.shape_cast %112 : vector<1x1x4x128xf32> to vector<4x128xf32>
      %114 = tpu.concatenate %57, %73, %89, %105 in 0 : vector<1x128xf32>, vector<1x128xf32>, vector<1x128xf32>, vector<1x128xf32> -> vector<4x128xf32>
      %115 = arith.addf %113, %114 : vector<4x128xf32>
      %c0_40 = arith.constant 0 : index
      %c0_41 = arith.constant 0 : index
      %c0_42 = arith.constant 0 : index
      %c0_43 = arith.constant 0 : index
      %116 = vector.load %arg4[%c0_40, %c0_41, %c0_42, %c0_43] : memref<1x3x4x128xf32, #tpu.memory_space<vmem>>, vector<1x1x4x128xf32>
      %117 = vector.shape_cast %116 : vector<1x1x4x128xf32> to vector<4x128xf32>
      %118 = vector.shape_cast %115 : vector<4x128xf32> to vector<1x1x4x128xf32>
      tpu.vector_store %arg4[%c0_40, %c0_41, %c0_42, %c0_43], %118 {strides = array<i32>} : memref<1x3x4x128xf32, #tpu.memory_space<vmem>>, vector<1x1x4x128xf32>,
      %c0_44 = arith.constant 0 : index
      %c1_45 = arith.constant 1 : index
      %c0_46 = arith.constant 0 : index
      %c0_47 = arith.constant 0 : index
      %119 = vector.load %arg4[%c0_44, %c1_45, %c0_46, %c0_47] : memref<1x3x4x128xf32, #tpu.memory_space<vmem>>, vector<1x1x4x128xf32>
      %120 = vector.shape_cast %119 : vector<1x1x4x128xf32> to vector<4x128xf32>
      %121 = tpu.concatenate %61, %77, %93, %109 in 0 : vector<1x128xf32>, vector<1x128xf32>, vector<1x128xf32>, vector<1x128xf32> -> vector<4x128xf32>
      %122 = arith.addf %120, %121 : vector<4x128xf32>
      %c0_48 = arith.constant 0 : index
      %c1_49 = arith.constant 1 : index
      %c0_50 = arith.constant 0 : index
      %c0_51 = arith.constant 0 : index
      %123 = vector.load %arg4[%c0_48, %c1_49, %c0_50, %c0_51] : memref<1x3x4x128xf32, #tpu.memory_space<vmem>>, vector<1x1x4x128xf32>
      %124 = vector.shape_cast %123 : vector<1x1x4x128xf32> to vector<4x128xf32>
      %125 = vector.shape_cast %122 : vector<4x128xf32> to vector<1x1x4x128xf32>
      tpu.vector_store %arg4[%c0_48, %c1_49, %c0_50, %c0_51], %125 {strides = array<i32>} : memref<1x3x4x128xf32, #tpu.memory_space<vmem>>, vector<1x1x4x128xf32>,
      %c0_52 = arith.constant 0 : index
      %c2_53 = arith.constant 2 : index
      %c0_54 = arith.constant 0 : index
      %c0_55 = arith.constant 0 : index
      %126 = vector.load %arg4[%c0_52, %c2_53, %c0_54, %c0_55] : memref<1x3x4x128xf32, #tpu.memory_space<vmem>>, vector<1x1x4x128xf32>
      %127 = vector.shape_cast %126 : vector<1x1x4x128xf32> to vector<4x128xf32>
      %128 = tpu.concatenate %63, %79, %95, %111 in 0 : vector<1x128xf32>, vector<1x128xf32>, vector<1x128xf32>, vector<1x128xf32> -> vector<4x128xf32>
      %129 = arith.addf %127, %128 : vector<4x128xf32>
      %c0_56 = arith.constant 0 : index
      %c2_57 = arith.constant 2 : index
      %c0_58 = arith.constant 0 : index
      %c0_59 = arith.constant 0 : index
      %130 = vector.load %arg4[%c0_56, %c2_57, %c0_58, %c0_59] : memref<1x3x4x128xf32, #tpu.memory_space<vmem>>, vector<1x1x4x128xf32>
      %131 = vector.shape_cast %130 : vector<1x1x4x128xf32> to vector<4x128xf32>
      %132 = vector.shape_cast %129 : vector<4x128xf32> to vector<1x1x4x128xf32>
      tpu.vector_store %arg4[%c0_56, %c2_57, %c0_58, %c0_59], %132 {strides = array<i32>} : memref<1x3x4x128xf32, #tpu.memory_space<vmem>>, vector<1x1x4x128xf32>,
    } else {
    }
    return
  }
  func.func @transform_0(%arg0: i32, %arg1: i32) -> (i32, i32, i32, i32) {
    %c0_i32 = arith.constant 0 : i32
    %c0_i32_0 = arith.constant 0 : i32
    %c0_i32_1 = arith.constant 0 : i32
    return %arg0, %c0_i32, %arg1, %c0_i32_0 : i32, i32, i32, i32
  }
  func.func @transform_1(%arg0: i32, %arg1: i32) -> (i32, i32, i32) {
    %c0_i32 = arith.constant 0 : i32
    %c0_i32_0 = arith.constant 0 : i32
    return %arg0, %arg1, %c0_i32 : i32, i32, i32
  }
  func.func @transform_2(%arg0: i32, %arg1: i32) -> (i32, i32, i32, i32) {
    %c0_i32 = arith.constant 0 : i32
    %c0_i32_0 = arith.constant 0 : i32
    %c0_i32_1 = arith.constant 0 : i32
    %c0_i32_2 = arith.constant 0 : i32
    return %arg0, %c0_i32, %c0_i32_0, %c0_i32_1 : i32, i32, i32, i32
  }
}

</mosaic_0001>

<bundles_post_ra>
// kernel: dice_loss.1
= control target key start
LH: loop header
LB: loop body
LE: loop exit
PB: predicated region body
PF: predicated region fallthrough
CT: control target
= control target key end

     0   :  { %s709_s9 = smov 0   ;;  %s711_s10 = smov 0   ;;  %s789_s0 = inlined_call_operand.vmem [shape: f32[2,4,8,128], index: 0, kind: input, shape index: {}]   ;;  %s790_s1 = inlined_call_operand.vmem [shape: s32[2,8,128], index: 1, kind: input, shape index: {}]   ;;  %s791_s2 = inlined_call_operand.vmem [shape: f32[2,3,4,128], index: 2, kind: output, shape index: {}]  }
   0x1   :  { %s713_s11 = smov 0  }
   0x2 LB: > { %s24_s12 = sadd.s32 1, %s687_s10  ;;  %p603_p0 = scmp.ge.s32.totalorder %s691_s11, 1  ;;  %s691_s11 = sphi %s713_s11, %s12_s11   ;;  %s687_s10 = sphi %s711_s10, %s793_s10   ;;  %s683_s9 = sphi %s709_s9, %s792_s9  }
   0x3   : > { %p26_p1 = scmp.ge.s32.totalorder %s24_s12, 2  ;;  %p143_p2 = scmp.lt.s32.totalorder %s691_s11, 3 }
   0x5   : > { %s795_s12 = smov (%p26_p1, %s24_s12), 0  ;;  %p144_p3 = pnand %p603_p0, %p143_p2 }
   0x6   : > { %p175_p4 = scmp.lt.s32.totalorder (!%p144_p3), %s683_s9, 1  ;;  %v693_v3 = vmov (!%p144_p3), 0.0   ;;  %vm493_vm4 = vcmask (!%p144_p3), 1040384   ;;  %vm495_vm5 = vcmask (!%p144_p3), 1041408   ;;  %vm497_vm6 = vcmask (!%p144_p3), 1042432  }
   0x7   : > { %147 = sbr.rel (%p144_p3) target bundleno = 82 (0x52), region = 28  ;;  %v386_v56 = vlaneseq (!%p144_p3) }
   0x9   : > { %v387_v58 = vshrl.u32 (!%p144_p3), %v386_v56, 7  ;;  %v389_v59 = vand.u32 (!%p144_p3), 127, %v386_v56 }
   0xb   : > { %v393_v60 = vmul.u32 (!%p144_p3), 128, %v387_v58 }
   0xd   : > { %v394_v61 = vadd.s32 (!%p144_p3), %v393_v60, %v389_v59 }
   0xe   : > { %s797_s9 = smov (!%p175_p4, %s683_s9), 1 }
   0xf   : > { %s632_s13 = sshll.u32 %s797_s9, 5  ;;  %s633_s14 = smul.u32 12, %s797_s9  ;;  %vm395_vm7 = vcmp.lt.s32.totalorder %v394_v61, 256 }
  0x10   : > { %s182_s17 = scalar_lea.vmem %s789_s0, %s632_s13  ;;  %s606_s18 = sshll.u32 %s797_s9, 3 }
  0x11   : > { %s733_s21 = scalar_lea.vmem %s791_s2, %s633_s14  ;;  %v356_v0 = vld [vmem:[%s182_s17] sm:$0xff]  ;;  %v619_v1 = vld [vmem:[%s182_s17 + $0x8] sm:$0xff]  ;;  %s189_s24 = scalar_lea.vmem %s790_s1, %s606_s18  ;;  %v620_v2 = vld [vmem:[%s182_s17 + $0x10] sm:$0xff] }
  0x12   : > { %199 = vst [vmem:[%s733_s21] sm:$0xf] %v693_v3  ;;  %v363_v4 = vmax.f32 %v356_v0, %v619_v1  ;;  %200 = vst [vmem:[%s733_s21 + $0x4] sm:$0xf] %v693_v3  ;;  %v355_v5 = vld [vmem:[%s189_s24] sm:$0xff]  ;;  %v621_v6 = vld [vmem:[%s182_s17 + $0x18] sm:$0xff] }
  0x13   : > { %201 = vst [vmem:[%s733_s21 + $0x8] sm:$0xf] %v693_v3  ;;  %vm396_vm0 = vcmp.eq.s32.totalorder %v355_v5, 0  ;;  %vm420_vm1 = vcmp.eq.s32.totalorder %v355_v5, 1  ;;  %vm444_vm2 = vcmp.eq.s32.totalorder %v355_v5, 2  ;;  %vm468_vm3 = vcmp.eq.s32.totalorder %v355_v5, 3 }
  0x14   : > { %v364_v7 = vmax.f32 %v363_v4, %v620_v2  ;;  %v741_v8 = vsel %vm396_vm0, 1.0, %v693_v3  ;;  %v743_v9 = vsel %vm420_vm1, 1.0, %v693_v3  ;;  %v745_v10 = vsel %vm444_vm2, 1.0, %v693_v3 }
  0x15   : > { %v747_v11 = vsel %vm468_vm3, 1.0, %v693_v3  ;;  %v408_v12 = vrot.slane %v741_v8, 4  ;;  %v432_v13 = vrot.slane %v743_v9, 4  ;;  %v456_v14 = vrot.slane %v745_v10, 4 }
  0x16   : > { %v365_v15 = vmax.f32 %v364_v7, %v621_v6  ;;  %v480_v16 = vrot.slane %v747_v11, 4 }
  0x17   : > { %v409_v17 = vadd.f32 %v741_v8, %v408_v12  ;;  %v433_v18 = vadd.f32 %v743_v9, %v432_v13  ;;  %v457_v19 = vadd.f32 %v745_v10, %v456_v14 }
  0x18   : > { %v366_v20 = vsub.f32 %v356_v0, %v365_v15  ;;  %v369_v21 = vsub.f32 %v619_v1, %v365_v15  ;;  %v372_v22 = vsub.f32 %v620_v2, %v365_v15  ;;  %v375_v23 = vsub.f32 %v621_v6, %v365_v15 }
  0x19   : > { %v410_v24 = vrot.slane %v409_v17, 2  ;;  %v434_v25 = vrot.slane %v433_v18, 2  ;;  %v458_v26 = vrot.slane %v457_v19, 2  ;;  %v481_v27 = vadd.f32 %v747_v11, %v480_v16  ;;  %v626_v46 = vld [vmem:[%s733_s21 + $0x4] sm:$0xf] }
  0x1a   : > { %v367_v28 = vmul.f32 1.442695, %v366_v20  ;;  %v370_v29 = vmul.f32 1.442695, %v369_v21  ;;  %v373_v30 = vmul.f32 1.442695, %v372_v22 }
  0x1b   : > { %v376_v31 = vmul.f32 1.442695, %v375_v23  ;;  %v411_v32 = vadd.f32 %v410_v24, %v409_v17  ;;  %v435_v33 = vadd.f32 %v434_v25, %v433_v18  ;;  %v459_v34 = vadd.f32 %v458_v26, %v457_v19  ;;  %v492_v59 = vld [vmem:[%s733_s21] sm:$0xf] }
  0x1c   : > { %659 = vpow2.f32 %v367_v28  ;;  %v482_v35 = vrot.slane %v481_v27, 2 }
  0x1d   : > { %661 = vpow2.f32 %v370_v29  ;;  %v412_v36 = vrot.slane %v411_v32, 1  ;;  %v436_v37 = vrot.slane %v435_v33, 1  ;;  %v460_v38 = vrot.slane %v459_v34, 1 }
  0x1e   : > { %663 = vpow2.f32 %v373_v30  ;;  %v483_v39 = vadd.f32 %v482_v35, %v481_v27 }
  0x1f   : > { %665 = vpow2.f32 %v376_v31  ;;  %v413_v40 = vadd.f32 %v412_v36, %v411_v32  ;;  %v437_v41 = vadd.f32 %v436_v37, %v435_v33  ;;  %v461_v42 = vadd.f32 %v460_v38, %v459_v34 }
  0x20   : > { %v484_v43 = vrot.slane %v483_v39, 1 }
  0x21   : > { %v503_v44 = vsel %vm493_vm4, %v413_v40, %v437_v41 }
  0x22   : > { %v485_v45 = vadd.f32 %v484_v43, %v483_v39  ;;  %v504_v47 = vsel %vm495_vm5, %v503_v44, %v461_v42 }
  0x24   : > { %v505_v48 = vsel %vm497_vm6, %v504_v47, %v485_v45 }
  0x25   : > { %v506_v49 = vadd.f32 %v626_v46, %v505_v48 }
  0x26   : > { %v660_v50 = vpop.eup %659 }
  0x27   : > { %v662_v51 = vpop.eup %661  ;;  %627 = vst [vmem:[%s733_s21 + $0x4] sm:$0xf] %v506_v49 }
  0x28   : > { %v664_v52 = vpop.eup %663  ;;  %v378_v53 = vadd.f32 %v662_v51, %v660_v50 }
  0x29   : > { %v666_v54 = vpop.eup %665 }
  0x2a   : > { %v379_v55 = vadd.f32 %v664_v52, %v378_v53 }
  0x2c   : > { %v380_v57 = vadd.f32 %v666_v54, %v379_v55 }
  0x2e   : > { %667 = vrcp.f32 %v380_v57 }
  0x38   : > { %v668_v62 = vpop.eup %667 }
  0x39   : > { %v382_v63 = vmul.f32 %v668_v62, %v660_v50  ;;  %v383_v0 = vmul.f32 %v668_v62, %v662_v51  ;;  %v384_v1 = vmul.f32 %v668_v62, %v664_v52  ;;  %v385_v2 = vmul.f32 %v668_v62, %v666_v54 }
  0x3b   : > { %v401_v3 = vmul.f32 %v741_v8, %v382_v63  ;;  %v425_v4 = vmul.f32 %v743_v9, %v383_v0  ;;  %v449_v5 = vmul.f32 %v745_v10, %v384_v1  ;;  %v473_v6 = vmul.f32 %v747_v11, %v385_v2 }
  0x3c   : > { %v399_v7 = vmul.f32 %v382_v63, %v382_v63  ;;  %v423_v12 = vmul.f32 %v383_v0, %v383_v0  ;;  %v447_v13 = vmul.f32 %v384_v1, %v384_v1  ;;  %v471_v14 = vmul.f32 %v385_v2, %v385_v2 }
  0x3d   : > { %v402_v15 = vrot.slane %v401_v3, 4  ;;  %v426_v16 = vrot.slane %v425_v4, 4  ;;  %v450_v17 = vrot.slane %v449_v5, 4  ;;  %v474_v18 = vrot.slane %v473_v6, 4 }
  0x3e   : > { %v400_v19 = vsel %vm395_vm7, %v399_v7, 0.0  ;;  %v424_v20 = vsel %vm395_vm7, %v423_v12, 0.0  ;;  %v448_v8 = vsel %vm395_vm7, %v447_v13, 0.0  ;;  %v472_v9 = vsel %vm395_vm7, %v471_v14, 0.0 }
  0x3f   : > { %v403_v21 = vadd.f32 %v402_v15, %v401_v3  ;;  %v427_v10 = vadd.f32 %v426_v16, %v425_v4  ;;  %v451_v22 = vadd.f32 %v450_v17, %v449_v5  ;;  %v475_v11 = vadd.f32 %v474_v18, %v473_v6  ;;  %v628_v4 = vld [vmem:[%s733_s21 + $0x8] sm:$0xf] }
  0x40   : > { %v414_v23 = vrot.slane %v400_v19, 4  ;;  %v438_v24 = vrot.slane %v424_v20, 4  ;;  %v462_v25 = vrot.slane %v448_v8, 4  ;;  %v486_v26 = vrot.slane %v472_v9, 4 }
  0x41   : > { %v404_v27 = vrot.slane %v403_v21, 2  ;;  %v428_v28 = vrot.slane %v427_v10, 2  ;;  %v452_v29 = vrot.slane %v451_v22, 2  ;;  %v476_v30 = vrot.slane %v475_v11, 2 }
  0x42   : > { %v415_v31 = vadd.f32 %v414_v23, %v400_v19  ;;  %v439_v32 = vadd.f32 %v438_v24, %v424_v20  ;;  %v463_v33 = vadd.f32 %v462_v25, %v448_v8  ;;  %v487_v34 = vadd.f32 %v486_v26, %v472_v9 }
  0x43   : > { %v405_v35 = vadd.f32 %v404_v27, %v403_v21  ;;  %v429_v36 = vadd.f32 %v428_v28, %v427_v10  ;;  %v453_v37 = vadd.f32 %v452_v29, %v451_v22  ;;  %v477_v38 = vadd.f32 %v476_v30, %v475_v11 }
  0x44   : > { %v416_v39 = vrot.slane %v415_v31, 2  ;;  %v440_v40 = vrot.slane %v439_v32, 2  ;;  %v464_v41 = vrot.slane %v463_v33, 2  ;;  %v488_v42 = vrot.slane %v487_v34, 2 }
  0x45   : > { %v406_v43 = vrot.slane %v405_v35, 1  ;;  %v430_v44 = vrot.slane %v429_v36, 1  ;;  %v454_v45 = vrot.slane %v453_v37, 1  ;;  %v478_v46 = vrot.slane %v477_v38, 1 }
  0x46   : > { %v417_v47 = vadd.f32 %v416_v39, %v415_v31  ;;  %v441_v48 = vadd.f32 %v440_v40, %v439_v32  ;;  %v465_v49 = vadd.f32 %v464_v41, %v463_v33  ;;  %v489_v50 = vadd.f32 %v488_v42, %v487_v34 }
  0x47   : > { %v407_v51 = vadd.f32 %v406_v43, %v405_v35  ;;  %v431_v52 = vadd.f32 %v430_v44, %v429_v36  ;;  %v455_v53 = vadd.f32 %v454_v45, %v453_v37  ;;  %v479_v54 = vadd.f32 %v478_v46, %v477_v38 }
  0x48   : > { %v418_v55 = vrot.slane %v417_v47, 1  ;;  %v442_v56 = vrot.slane %v441_v48, 1  ;;  %v466_v57 = vrot.slane %v465_v49, 1  ;;  %v490_v58 = vrot.slane %v489_v50, 1 }
  0x49   : > { %v494_v60 = vsel %vm493_vm4, %v407_v51, %v431_v52 }
  0x4a   : > { %v496_v61 = vsel %vm495_vm5, %v494_v60, %v455_v53  ;;  %v419_v62 = vadd.f32 %v418_v55, %v417_v47  ;;  %v443_v63 = vadd.f32 %v442_v56, %v441_v48  ;;  %v467_v0 = vadd.f32 %v466_v57, %v465_v49 }
  0x4b   : > { %v498_v1 = vsel %vm497_vm6, %v496_v61, %v479_v54  ;;  %v491_v2 = vadd.f32 %v490_v58, %v489_v50 }
  0x4c   : > { %v499_v3 = vadd.f32 %v498_v1, %v492_v59  ;;  %v510_v5 = vsel %vm493_vm4, %v419_v62, %v443_v63 }
  0x4d   : > { %v511_v6 = vsel %vm495_vm5, %v510_v5, %v467_v0 }
  0x4e   : > { %500 = vst [vmem:[%s733_s21] sm:$0xf] %v499_v3  ;;  %v512_v7 = vsel %vm497_vm6, %v511_v6, %v491_v2 }
  0x4f   : > { %v513_v12 = vadd.f32 %v628_v4, %v512_v7 }
  0x51   : > { %629 = vst [vmem:[%s733_s21 + $0x8] sm:$0xf] %v513_v12 }
  0x52 PF: > { %s12_s11 = sadd.s32 1, %s691_s11   ;;  %s792_s9 = smov %s687_s10 }
  0x53   : > { %p9_p5 = scmp.ge.s32.totalorder %s12_s11, 4   ;;  %s793_s10 = smov %s795_s12 }
  0x55   :  { %11 = sbr.rel (!%p9_p5) target bundleno = 2 (0x2), region = 83 }

</bundles_post_ra>
